<compile_context>
chip_gen: v7x
topology: tpu7x:2x2x1
jax: 0.10.0
libtpu: 0.0.40
codegen_flags: <defaults>
</compile_context>

<pallas_src>
import jax
import jax.numpy as jnp
from jax import lax
from jax.experimental import pallas as pl
from jax.experimental.pallas import tpu as pltpu


_SUB = 8      # sublane granularity (rows)
_LANE = 128   # lane granularity


def _round_up(v, m):
    return ((v + m - 1) // m) * m


def _round_down(v, m):
    return (v // m) * m


def _linear_kernel_vpu(x_ref, w_ref, b_ref, o_ref):
    # x_ref: (TB, D) VMEM (caller dtype); w_ref: (1, D) f32 VMEM;
    # b_ref: (1,) f32 SMEM; o_ref: (TB, 1) VMEM (caller dtype).
    x = x_ref[...].astype(jnp.float32)                       # full-tile, f32 acc
    acc = jnp.sum(x * w_ref[...], axis=-1, keepdims=True)    # lane reduce (XLU)
    o_ref[...] = (acc + b_ref[0]).astype(o_ref.dtype)


def _linear_kernel_mxu(x_ref, w_ref, b_ref, o_ref):
    # Large-D path: put the contraction on the MXU (x @ w^T, f32 accumulate).
    x = x_ref[...]
    w = w_ref[...].astype(x.dtype)                           # (1, D)
    acc = lax.dot_general(x, w, (((1,), (1,)), ((), ())),
                          preferred_element_type=jnp.float32)  # (TB, 1)
    o_ref[...] = (acc + b_ref[0]).astype(o_ref.dtype)


def _choose_tb(B, D, x_itemsize):
    """Batch-tile (rows per grid step).

    Target ~2 MiB of useful x data per step (amortize ~0.35 us per-step
    pipeline overhead), capped by a VMEM budget that accounts for lane padding
    of the blocks, and split so a v7x megacore sees >= 2 grid steps for
    mid/large batches.
    """
    d_lanes = _round_up(max(D, 1), _LANE)                 # lane-padded VMEM width
    # up to 3 x buffers (Buffered(3)) + 2 output buffers, per row:
    bytes_per_row = 3 * d_lanes * x_itemsize + 2 * _LANE * 4
    VMEM_BUDGET = 20 * 1024 * 1024                        # safe under 32 MiB scoped
    tb_vmem = max(_SUB, _round_down(VMEM_BUDGET // bytes_per_row, _SUB))
    TARGET_BYTES = 2 * 1024 * 1024
    tb_hbm = max(_SUB, _round_down(TARGET_BYTES // max(1, D * x_itemsize), _SUB))
    tb = min(tb_vmem, tb_hbm)
    # v7x: guarantee >= 2 "parallel" grid steps once the batch is big enough.
    b_pad = _round_up(B, _SUB)
    if b_pad >= 2 * 256:
        tb = min(tb, _round_up(pl.cdiv(b_pad, 2), _SUB))
    if tb >= B:
        return B          # single block == full array dim (always legal)
    return tb


def test_samnet_forward(x, weight, bias):
    """Pallas implementation of TestSAMNet.forward (nn.Linear(n_dim, 1)).

    x: (B, D) float32 or bfloat16; weight: (1, D) or (D,); bias: (1,) or ().
    Returns (B, 1) in x.dtype, matching PyTorch Linear semantics.
    """
    B, D = x.shape
    w2d = jnp.asarray(weight, jnp.float32).reshape(1, D)   # (1, D) -> VMEM
    b1d = jnp.asarray(bias, jnp.float32).reshape(1)        # (1,)   -> SMEM

    TB = _choose_tb(B, D, x.dtype.itemsize)
    n_steps = pl.cdiv(B, TB)                 # ragged last block handled by Pallas

    # Deeper x prefetch only when there are enough steps for it to matter
    # (mainly helps v5e's lower HBM bandwidth; neutral elsewhere).
    if n_steps >= 3:
        x_spec = pl.BlockSpec((TB, D), lambda i: (i, 0),
                              pipeline_mode=pl.Buffered(3))
    else:
        x_spec = pl.BlockSpec((TB, D), lambda i: (i, 0))

    kernel = _linear_kernel_mxu if D >= 256 else _linear_kernel_vpu

    out = pl.pallas_call(
        kernel,
        out_shape=jax.ShapeDtypeStruct((B, 1), x.dtype),
        grid_spec=pltpu.PrefetchScalarGridSpec(
            num_scalar_prefetch=0,
            grid=(n_steps,),
            in_specs=[
                x_spec,                                               # x (TB, D)
                pl.BlockSpec((1, D), lambda i: (0, 0)),               # weight
                pl.BlockSpec(memory_space=pltpu.MemorySpace.SMEM),    # bias
            ],
            out_specs=pl.BlockSpec((TB, 1), lambda i: (i, 0)),
        ),
        compiler_params=pltpu.CompilerParams(
            dimension_semantics=("parallel",),     # megacore-shardable (v7x)
            vmem_limit_bytes=32 * 1024 * 1024,     # safe on v5e/v6e/v7x
        ),
    )(x, w2d, b1d)

    return out


if __name__ == "__main__":
    key = jax.random.PRNGKey(0)
    n_dim = 2
    batch = 8

    kx, kw, kb = jax.random.split(key, 3)
    x = jax.random.normal(kx, (batch, n_dim), dtype=jnp.float32)
    # Deterministic "Kaiming-uniform-like" init for fc1 = Linear(n_dim, 1)
    bound = 1.0 / (n_dim ** 0.5)
    weight = jax.random.uniform(kw, (1, n_dim), minval=-bound, maxval=bound,
                                dtype=jnp.float32)
    bias = jax.random.uniform(kb, (1,), minval=-bound, maxval=bound,
                              dtype=jnp.float32)

    out = test_samnet_forward(x, weight, bias)
    jax.block_until_ready(out)

    # Reference check against plain JAX (same semantics as PyTorch Linear).
    ref = x @ weight.T + bias
    assert out.shape == (batch, 1)
    assert jnp.allclose(out, ref, atol=1e-5, rtol=1e-5)

    print("KERNEL_OK")
</pallas_src>

<mosaic_0001>
module attributes {stable_mosaic.version = 11 : i64} {
  func.func @_linear_kernel_vpu(%arg0: i32, %arg1: memref<8x2xf32, #tpu.memory_space<vmem>>, %arg2: memref<1x2xf32, #tpu.memory_space<vmem>>, %arg3: memref<1xf32, #tpu.memory_space<smem>>, %arg4: memref<8x1xf32, #tpu.memory_space<vmem>>) attributes {dimension_semantics = [#tpu.dimension_semantics<parallel>], iteration_bounds = array<i64: 1>, scalar_prefetch = 0 : i64, scratch_operands = 0 : i64, tpu.core_type = #tpu.core_type<tc>, window_params = [{transform_indices = @transform_0, window_bounds = array<i64: 8, 2>}, {pipeline_mode = #tpu.pipeline_mode<synchronous>, transform_indices = @transform_1, window_bounds = array<i64: 1, 2>}, {transform_indices = @transform_2, window_bounds = array<i64: 1>}, {transform_indices = @transform_3, window_bounds = array<i64: 8, 1>}]} {
    %c0 = arith.constant 0 : index
    %c0_0 = arith.constant 0 : index
    %0 = vector.load %arg1[%c0, %c0_0] : memref<8x2xf32, #tpu.memory_space<vmem>>, vector<8x2xf32>
    %c0_1 = arith.constant 0 : index
    %c0_2 = arith.constant 0 : index
    %1 = vector.load %arg2[%c0_1, %c0_2] : memref<1x2xf32, #tpu.memory_space<vmem>>, vector<1x2xf32>
    %2 = vector.broadcast %1 : vector<1x2xf32> to vector<8x2xf32>
    %3 = arith.mulf %0, %2 : vector<8x2xf32>
    %cst = arith.constant dense<0.000000e+00> : vector<8xf32>
    %4 = vector.multi_reduction <add>, %3, %cst [1] : vector<8x2xf32> to vector<8xf32>
    %5 = vector.shape_cast %4 : vector<8xf32> to vector<8x1xf32>
    %c0_3 = arith.constant 0 : index
    %6 = memref.load %arg3[%c0_3] : memref<1xf32, #tpu.memory_space<smem>>
    %7 = vector.broadcast %6 : f32 to vector<8x1xf32>
    %8 = arith.addf %5, %7 : vector<8x1xf32>
    %c0_4 = arith.constant 0 : index
    %c0_5 = arith.constant 0 : index
    %9 = vector.load %arg4[%c0_4, %c0_5] : memref<8x1xf32, #tpu.memory_space<vmem>>, vector<8x1xf32>
    tpu.vector_store %arg4[%c0_4, %c0_5], %8 {strides = array<i32>} : memref<8x1xf32, #tpu.memory_space<vmem>>, vector<8x1xf32>,
    return
  }
  func.func @transform_0(%arg0: i32) -> (i32, i32) {
    %c0_i32 = arith.constant 0 : i32
    %c0_i32_0 = arith.constant 0 : i32
    return %arg0, %c0_i32 : i32, i32
  }
  func.func @transform_1(%arg0: i32) -> (i32, i32) {
    %c0_i32 = arith.constant 0 : i32
    %c0_i32_0 = arith.constant 0 : i32
    %c0_i32_1 = arith.constant 0 : i32
    return %c0_i32, %c0_i32_0 : i32, i32
  }
  func.func @transform_2(%arg0: i32) -> i32 {
    %c0_i32 = arith.constant 0 : i32
    %c0_i32_0 = arith.constant 0 : i32
    return %c0_i32 : i32
  }
  func.func @transform_3(%arg0: i32) -> (i32, i32) {
    %c0_i32 = arith.constant 0 : i32
    %c0_i32_0 = arith.constant 0 : i32
    return %arg0, %c0_i32 : i32, i32
  }
}

</mosaic_0001>

<bundles_post_ra>
// kernel: tpu_custom_call.1
= control target key start
LH: loop header
LB: loop body
LE: loop exit
PB: predicated region body
PF: predicated region fallthrough
CT: control target
= control target key end

     0   :  { %vm24_vm0 = vcmask 15360   ;;  %vm31_vm1 = vcmask 7168   ;;  %s70_s0 = inlined_call_operand.vmem [shape: f32[8,2], index: 0, kind: input, shape index: {}]   ;;  %s71_s1 = inlined_call_operand.vmem [shape: f32[1,2], index: 1, kind: input, shape index: {}]   ;;  %s72_s2 = inlined_call_operand.<no memory space> [shape: f32[1], index: 2, kind: input, shape index: {}]   ;;  %s73_s3 = inlined_call_operand.vmem [shape: f32[8,1], index: 3, kind: output, shape index: {}]  }
   0x1   :  { %v15_v0 = vld [vmem:[%s70_s0] sm:$0xff]  ;;  %v29_v4 = vstv %s72_s2 }
   0x2   :  { %v37_v1 = vld [vmem:[%s71_s1] ss:$0 sm:$0xff] }
   0x3   :  { %v23_v2 = vmul.f32 %v37_v1, %v15_v0 }
   0x5   :  { %v25_v3 = vsel %vm24_vm0, %v23_v2, 0.0 }
   0x6   :  { %26 = vadd.xlane.f32.xlu0 %v25_v3 }
  0x93   :  { %v27_v5 = vpop.xlane.xlu0 %26 }
  0x94   :  { %v30_v6 = vadd.f32 %v29_v4, %v27_v5 }
  0x96   :  { %32 = vst.msk [vmem:[%s73_s3] sm:$0xff] %vm31_vm1, %v30_v6 }

</bundles_post_ra>
